<compile_context>
chip_gen: v5e
topology: v5e:2x2
jax: 0.10.0
libtpu: 0.0.40
codegen_flags: <defaults>
</compile_context>

<pallas_src>
import functools

import jax
import jax.numpy as jnp
from jax.experimental import pallas as pl
from jax.experimental.pallas import tpu as pltpu

INPUT_SIZE = 28
HIDDEN = 64
OUT_FEATURES = 20
OUT_PAD = 128  # lane-dense padded output width


def _lstm_last_linear_kernel(x_ref, wih_ref, whh_ref, b_ref, wout_ref,
                             bout_ref, out_ref, *, batch, seq):
    """x_ref: (T*B, I) time-major bf16. Weights pre-transposed/reordered."""
    H = whh_ref.shape[0]

    # Stationary operands: load from VMEM exactly once, before the loop.
    wih = wih_ref[...]        # (I, 4H)  bf16, columns ordered (i, f, o, g)
    whh = whh_ref[...]        # (H, 4H)  bf16, stationary across all steps
    bias = b_ref[...]         # (1, 4H)  f32  (b_ih + b_hh)
    wout = wout_ref[...]      # (H, 128) f32  (zero-padded W_out^T)
    bout = bout_ref[...]      # (1, 128) f32

    # Hoisted input projection: one (T*B, I) @ (I, 4H) matmul, off the chain.
    gates_x = jnp.dot(x_ref[...], wih,
                      preferred_element_type=jnp.float32) + bias  # (T*B, 4H)

    h = jnp.zeros((batch, H), jnp.float32)
    c = jnp.zeros((batch, H), jnp.float32)

    # Static unroll (T is a trace-time constant): full scheduler visibility.
    for t in range(seq):
        g_pre = gates_x[t * batch:(t + 1) * batch, :]        # static 2-row slice
        if t > 0:  # h == 0 at t == 0, skip the recurrent matmul entirely
            g_pre = g_pre + jnp.dot(h.astype(jnp.bfloat16), whh,
                                    preferred_element_type=jnp.float32)
        # sigmoid(x) == 0.5*tanh(0.5*x) + 0.5  -> single EUP push per element
        ifo = 0.5 * jnp.tanh(0.5 * g_pre[:, :3 * H]) + 0.5    # (B, 3H) slab
        g_g = jnp.tanh(g_pre[:, 3 * H:])                      # (B, H) slab
        i_g = ifo[:, 0 * H:1 * H]
        f_g = ifo[:, 1 * H:2 * H]
        o_g = ifo[:, 2 * H:3 * H]
        c = f_g * c + i_g * g_g
        h = o_g * jnp.tanh(c)

    # Fused Linear epilogue on the last hidden state (lane-dense 128 cols).
    out_ref[...] = (jnp.dot(h, wout, preferred_element_type=jnp.float32)
                    + bout).astype(out_ref.dtype)


def prepare_params(params):
    """One-time weight preprocessing (call once at init, reuse every step)."""
    w_ih, w_hh, b_ih, b_hh, w_out, b_out = params
    H = w_hh.shape[1]

    def reorder_gates(a):
        # PyTorch gate-block order (i, f, g, o) -> (i, f, o, g)
        i, f, g, o = jnp.split(a, 4, axis=0)
        return jnp.concatenate([i, f, o, g], axis=0)

    wih_t = jnp.transpose(reorder_gates(w_ih)).astype(jnp.bfloat16)   # (I, 4H)
    whh_t = jnp.transpose(reorder_gates(w_hh)).astype(jnp.bfloat16)   # (H, 4H)
    b = reorder_gates(b_ih + b_hh).reshape(1, 4 * H).astype(jnp.float32)
    wout_pad = jnp.zeros((H, OUT_PAD), jnp.float32).at[:, :OUT_FEATURES].set(
        jnp.transpose(w_out).astype(jnp.float32))                     # (H, 128)
    bout_pad = jnp.zeros((1, OUT_PAD), jnp.float32).at[:, :OUT_FEATURES].set(
        b_out.astype(jnp.float32))
    prepared = (wih_t, whh_t, b, wout_pad, bout_pad)
    return jax.tree_util.tree_map(jax.block_until_ready, prepared)


def rnn_forward(x, prepared):
    """x: (B, T, I) batch-first (like PyTorch). Returns (B, 20)."""
    wih_t, whh_t, b, wout_pad, bout_pad = prepared
    B, T, I = x.shape
    H = whh_t.shape[0]

    # Time-major, flat (T*B, I): kernel does zero reshapes / relayouts.
    # (tiny array: this wrapper transpose+cast is ~free)
    x_tm = jnp.transpose(x, (1, 0, 2)).reshape(T * B, I).astype(jnp.bfloat16)

    flops = (2 * T * B * I * 4 * H            # hoisted input projection
             + (T - 1) * 2 * B * H * 4 * H    # recurrent matmuls (t=0 skipped)
             + 2 * B * H * OUT_PAD)           # output Linear
    transcendentals = T * B * 5 * H           # 4 gate tanh + 1 cell tanh per step
    bytes_accessed = (2 * (x_tm.size + wih_t.size + whh_t.size)
                      + 4 * (b.size + wout_pad.size + bout_pad.size
                             + B * OUT_PAD))

    kernel = functools.partial(_lstm_last_linear_kernel, batch=B, seq=T)

    out_padded = pl.pallas_call(
        kernel,
        out_shape=jax.ShapeDtypeStruct((B, OUT_PAD), jnp.float32),
        in_specs=[pl.BlockSpec(memory_space=pltpu.MemorySpace.VMEM)] * 6,
        out_specs=pl.BlockSpec(memory_space=pltpu.MemorySpace.VMEM),
        cost_estimate=pl.CostEstimate(flops=flops,
                                      transcendentals=transcendentals,
                                      bytes_accessed=bytes_accessed),
    )(x_tm, wih_t, whh_t, b, wout_pad, bout_pad)

    return out_padded[:, :OUT_FEATURES]


def rnn_forward_ref(x, params):
    """Pure-JAX f32 reference (matches PyTorch nn.LSTM + nn.Linear semantics)."""
    w_ih, w_hh, b_ih, b_hh, w_out, b_out = params
    B, T, I = x.shape
    H = w_hh.shape[1]

    def step(carry, x_t):
        h, c = carry
        gates = x_t @ w_ih.T + b_ih + h @ w_hh.T + b_hh
        i_g = jax.nn.sigmoid(gates[:, 0 * H:1 * H])
        f_g = jax.nn.sigmoid(gates[:, 1 * H:2 * H])
        g_g = jnp.tanh(gates[:, 2 * H:3 * H])
        o_g = jax.nn.sigmoid(gates[:, 3 * H:4 * H])
        c = f_g * c + i_g * g_g
        h = o_g * jnp.tanh(c)
        return (h, c), h

    h0 = jnp.zeros((B, H), x.dtype)
    c0 = jnp.zeros((B, H), x.dtype)
    (h_T, _), _ = jax.lax.scan(step, (h0, c0), jnp.transpose(x, (1, 0, 2)))
    return h_T @ w_out.T + b_out


def init_params(key):
    """Deterministic init mimicking PyTorch uniform(-1/sqrt(H), 1/sqrt(H))."""
    k = 1.0 / jnp.sqrt(jnp.float32(HIDDEN))
    keys = jax.random.split(key, 6)
    w_ih = jax.random.uniform(keys[0], (4 * HIDDEN, INPUT_SIZE), jnp.float32, -k, k)
    w_hh = jax.random.uniform(keys[1], (4 * HIDDEN, HIDDEN), jnp.float32, -k, k)
    b_ih = jax.random.uniform(keys[2], (4 * HIDDEN,), jnp.float32, -k, k)
    b_hh = jax.random.uniform(keys[3], (4 * HIDDEN,), jnp.float32, -k, k)
    w_out = jax.random.uniform(keys[4], (OUT_FEATURES, HIDDEN), jnp.float32, -k, k)
    b_out = jax.random.uniform(keys[5], (OUT_FEATURES,), jnp.float32, -k, k)
    return (w_ih, w_hh, b_ih, b_hh, w_out, b_out)


if __name__ == "__main__":
    key = jax.random.PRNGKey(0)
    k_param, k_x = jax.random.split(key)
    params = init_params(k_param)

    # One-time (cached) weight preprocessing — not part of the per-call path.
    prepared = prepare_params(params)

    B, T = 2, 8
    x = jax.random.normal(k_x, (B, T, INPUT_SIZE), jnp.float32)

    fwd = jax.jit(rnn_forward)
    out = jax.block_until_ready(fwd(x, prepared))

    ref = jax.block_until_ready(rnn_forward_ref(x, params))
    assert out.shape == (B, OUT_FEATURES)
    # bf16 MXU inputs on the recurrence -> loosen tolerance vs the f32 reference.
    assert jnp.allclose(out, ref, atol=2e-2, rtol=2e-2), (
        f"mismatch vs reference, max abs diff = {jnp.max(jnp.abs(out - ref))}")

    print("KERNEL_OK")
</pallas_src>

<mosaic_0001>
module attributes {stable_mosaic.version = 11 : i64} {
  func.func @_lstm_last_linear_kernel(%arg0: memref<16x28xbf16, #tpu.memory_space<vmem>>, %arg1: memref<28x256xbf16, #tpu.memory_space<vmem>>, %arg2: memref<64x256xbf16, #tpu.memory_space<vmem>>, %arg3: memref<1x256xf32, #tpu.memory_space<vmem>>, %arg4: memref<64x128xf32, #tpu.memory_space<vmem>>, %arg5: memref<1x128xf32, #tpu.memory_space<vmem>>, %arg6: memref<2x128xf32, #tpu.memory_space<vmem>>) attributes {dimension_semantics = [], scalar_prefetch = 0 : i64, scratch_operands = 0 : i64, tpu.core_type = #tpu.core_type<tc>} {
    %c0 = arith.constant 0 : index
    %c0_0 = arith.constant 0 : index
    %0 = vector.load %arg1[%c0, %c0_0] : memref<28x256xbf16, #tpu.memory_space<vmem>>, vector<28x256xbf16>
    %c0_1 = arith.constant 0 : index
    %c0_2 = arith.constant 0 : index
    %1 = vector.load %arg2[%c0_1, %c0_2] : memref<64x256xbf16, #tpu.memory_space<vmem>>, vector<64x256xbf16>
    %c0_3 = arith.constant 0 : index
    %c0_4 = arith.constant 0 : index
    %2 = vector.load %arg3[%c0_3, %c0_4] : memref<1x256xf32, #tpu.memory_space<vmem>>, vector<1x256xf32>
    %c0_5 = arith.constant 0 : index
    %c0_6 = arith.constant 0 : index
    %3 = vector.load %arg4[%c0_5, %c0_6] : memref<64x128xf32, #tpu.memory_space<vmem>>, vector<64x128xf32>
    %c0_7 = arith.constant 0 : index
    %c0_8 = arith.constant 0 : index
    %4 = vector.load %arg5[%c0_7, %c0_8] : memref<1x128xf32, #tpu.memory_space<vmem>>, vector<1x128xf32>
    %c0_9 = arith.constant 0 : index
    %c0_10 = arith.constant 0 : index
    %5 = vector.load %arg0[%c0_9, %c0_10] : memref<16x28xbf16, #tpu.memory_space<vmem>>, vector<16x28xbf16>
    %cst = arith.constant dense<0.000000e+00> : vector<16x256xf32>
    %6 = tpu.matmul %5, %0, %cst {dimension_numbers = #tpu.dot_dimension_numbers<[1], [0], [0], [1], [0, 0, 1, 1], [], []>} : vector<16x28xbf16>, vector<28x256xbf16>, vector<16x256xf32> -> vector<16x256xf32>
    %7 = vector.broadcast %2 : vector<1x256xf32> to vector<16x256xf32>
    %8 = arith.addf %6, %7 : vector<16x256xf32>
    %cst_11 = arith.constant 0.000000e+00 : f32
    %9 = vector.broadcast %cst_11 : f32 to vector<2x64xf32>
    %10 = vector.extract_strided_slice %8 {offsets = [0, 0], sizes = [2, 256], strides = [1, 1]} : vector<16x256xf32> to vector<2x256xf32>
    %11 = vector.extract_strided_slice %10 {offsets = [0, 0], sizes = [2, 192], strides = [1, 1]} : vector<2x256xf32> to vector<2x192xf32>
    %cst_12 = arith.constant 5.000000e-01 : f32
    %12 = vector.broadcast %cst_12 : f32 to vector<2x192xf32>
    %13 = arith.mulf %12, %11 : vector<2x192xf32>
    %14 = math.tanh %13 : vector<2x192xf32>
    %cst_13 = arith.constant 5.000000e-01 : f32
    %15 = vector.broadcast %cst_13 : f32 to vector<2x192xf32>
    %16 = arith.mulf %15, %14 : vector<2x192xf32>
    %cst_14 = arith.constant 5.000000e-01 : f32
    %17 = vector.broadcast %cst_14 : f32 to vector<2x192xf32>
    %18 = arith.addf %16, %17 : vector<2x192xf32>
    %19 = vector.extract_strided_slice %10 {offsets = [0, 192], sizes = [2, 64], strides = [1, 1]} : vector<2x256xf32> to vector<2x64xf32>
    %20 = math.tanh %19 : vector<2x64xf32>
    %21 = vector.extract_strided_slice %18 {offsets = [0, 0], sizes = [2, 64], strides = [1, 1]} : vector<2x192xf32> to vector<2x64xf32>
    %22 = vector.extract_strided_slice %18 {offsets = [0, 64], sizes = [2, 64], strides = [1, 1]} : vector<2x192xf32> to vector<2x64xf32>
    %23 = vector.extract_strided_slice %18 {offsets = [0, 128], sizes = [2, 64], strides = [1, 1]} : vector<2x192xf32> to vector<2x64xf32>
    %24 = arith.mulf %22, %9 : vector<2x64xf32>
    %25 = arith.mulf %21, %20 : vector<2x64xf32>
    %26 = arith.addf %24, %25 : vector<2x64xf32>
    %27 = math.tanh %26 : vector<2x64xf32>
    %28 = arith.mulf %23, %27 : vector<2x64xf32>
    %29 = vector.extract_strided_slice %8 {offsets = [2, 0], sizes = [2, 256], strides = [1, 1]} : vector<16x256xf32> to vector<2x256xf32>
    %30 = arith.truncf %28 : vector<2x64xf32> to vector<2x64xbf16>
    %cst_15 = arith.constant dense<0.000000e+00> : vector<2x256xf32>
    %31 = tpu.matmul %30, %1, %cst_15 {dimension_numbers = #tpu.dot_dimension_numbers<[1], [0], [0], [1], [0, 0, 1, 1], [], []>} : vector<2x64xbf16>, vector<64x256xbf16>, vector<2x256xf32> -> vector<2x256xf32>
    %32 = arith.addf %29, %31 : vector<2x256xf32>
    %33 = vector.extract_strided_slice %32 {offsets = [0, 0], sizes = [2, 192], strides = [1, 1]} : vector<2x256xf32> to vector<2x192xf32>
    %cst_16 = arith.constant 5.000000e-01 : f32
    %34 = vector.broadcast %cst_16 : f32 to vector<2x192xf32>
    %35 = arith.mulf %34, %33 : vector<2x192xf32>
    %36 = math.tanh %35 : vector<2x192xf32>
    %cst_17 = arith.constant 5.000000e-01 : f32
    %37 = vector.broadcast %cst_17 : f32 to vector<2x192xf32>
    %38 = arith.mulf %37, %36 : vector<2x192xf32>
    %cst_18 = arith.constant 5.000000e-01 : f32
    %39 = vector.broadcast %cst_18 : f32 to vector<2x192xf32>
    %40 = arith.addf %38, %39 : vector<2x192xf32>
    %41 = vector.extract_strided_slice %32 {offsets = [0, 192], sizes = [2, 64], strides = [1, 1]} : vector<2x256xf32> to vector<2x64xf32>
    %42 = math.tanh %41 : vector<2x64xf32>
    %43 = vector.extract_strided_slice %40 {offsets = [0, 0], sizes = [2, 64], strides = [1, 1]} : vector<2x192xf32> to vector<2x64xf32>
    %44 = vector.extract_strided_slice %40 {offsets = [0, 64], sizes = [2, 64], strides = [1, 1]} : vector<2x192xf32> to vector<2x64xf32>
    %45 = vector.extract_strided_slice %40 {offsets = [0, 128], sizes = [2, 64], strides = [1, 1]} : vector<2x192xf32> to vector<2x64xf32>
    %46 = arith.mulf %44, %26 : vector<2x64xf32>
    %47 = arith.mulf %43, %42 : vector<2x64xf32>
    %48 = arith.addf %46, %47 : vector<2x64xf32>
    %49 = math.tanh %48 : vector<2x64xf32>
    %50 = arith.mulf %45, %49 : vector<2x64xf32>
    %51 = vector.extract_strided_slice %8 {offsets = [4, 0], sizes = [2, 256], strides = [1, 1]} : vector<16x256xf32> to vector<2x256xf32>
    %52 = arith.truncf %50 : vector<2x64xf32> to vector<2x64xbf16>
    %cst_19 = arith.constant dense<0.000000e+00> : vector<2x256xf32>
    %53 = tpu.matmul %52, %1, %cst_19 {dimension_numbers = #tpu.dot_dimension_numbers<[1], [0], [0], [1], [0, 0, 1, 1], [], []>} : vector<2x64xbf16>, vector<64x256xbf16>, vector<2x256xf32> -> vector<2x256xf32>
    %54 = arith.addf %51, %53 : vector<2x256xf32>
    %55 = vector.extract_strided_slice %54 {offsets = [0, 0], sizes = [2, 192], strides = [1, 1]} : vector<2x256xf32> to vector<2x192xf32>
    %cst_20 = arith.constant 5.000000e-01 : f32
    %56 = vector.broadcast %cst_20 : f32 to vector<2x192xf32>
    %57 = arith.mulf %56, %55 : vector<2x192xf32>
    %58 = math.tanh %57 : vector<2x192xf32>
    %cst_21 = arith.constant 5.000000e-01 : f32
    %59 = vector.broadcast %cst_21 : f32 to vector<2x192xf32>
    %60 = arith.mulf %59, %58 : vector<2x192xf32>
    %cst_22 = arith.constant 5.000000e-01 : f32
    %61 = vector.broadcast %cst_22 : f32 to vector<2x192xf32>
    %62 = arith.addf %60, %61 : vector<2x192xf32>
    %63 = vector.extract_strided_slice %54 {offsets = [0, 192], sizes = [2, 64], strides = [1, 1]} : vector<2x256xf32> to vector<2x64xf32>
    %64 = math.tanh %63 : vector<2x64xf32>
    %65 = vector.extract_strided_slice %62 {offsets = [0, 0], sizes = [2, 64], strides = [1, 1]} : vector<2x192xf32> to vector<2x64xf32>
    %66 = vector.extract_strided_slice %62 {offsets = [0, 64], sizes = [2, 64], strides = [1, 1]} : vector<2x192xf32> to vector<2x64xf32>
    %67 = vector.extract_strided_slice %62 {offsets = [0, 128], sizes = [2, 64], strides = [1, 1]} : vector<2x192xf32> to vector<2x64xf32>
    %68 = arith.mulf %66, %48 : vector<2x64xf32>
    %69 = arith.mulf %65, %64 : vector<2x64xf32>
    %70 = arith.addf %68, %69 : vector<2x64xf32>
    %71 = math.tanh %70 : vector<2x64xf32>
    %72 = arith.mulf %67, %71 : vector<2x64xf32>
    %73 = vector.extract_strided_slice %8 {offsets = [6, 0], sizes = [2, 256], strides = [1, 1]} : vector<16x256xf32> to vector<2x256xf32>
    %74 = arith.truncf %72 : vector<2x64xf32> to vector<2x64xbf16>
    %cst_23 = arith.constant dense<0.000000e+00> : vector<2x256xf32>
    %75 = tpu.matmul %74, %1, %cst_23 {dimension_numbers = #tpu.dot_dimension_numbers<[1], [0], [0], [1], [0, 0, 1, 1], [], []>} : vector<2x64xbf16>, vector<64x256xbf16>, vector<2x256xf32> -> vector<2x256xf32>
    %76 = arith.addf %73, %75 : vector<2x256xf32>
    %77 = vector.extract_strided_slice %76 {offsets = [0, 0], sizes = [2, 192], strides = [1, 1]} : vector<2x256xf32> to vector<2x192xf32>
    %cst_24 = arith.constant 5.000000e-01 : f32
    %78 = vector.broadcast %cst_24 : f32 to vector<2x192xf32>
    %79 = arith.mulf %78, %77 : vector<2x192xf32>
    %80 = math.tanh %79 : vector<2x192xf32>
    %cst_25 = arith.constant 5.000000e-01 : f32
    %81 = vector.broadcast %cst_25 : f32 to vector<2x192xf32>
    %82 = arith.mulf %81, %80 : vector<2x192xf32>
    %cst_26 = arith.constant 5.000000e-01 : f32
    %83 = vector.broadcast %cst_26 : f32 to vector<2x192xf32>
    %84 = arith.addf %82, %83 : vector<2x192xf32>
    %85 = vector.extract_strided_slice %76 {offsets = [0, 192], sizes = [2, 64], strides = [1, 1]} : vector<2x256xf32> to vector<2x64xf32>
    %86 = math.tanh %85 : vector<2x64xf32>
    %87 = vector.extract_strided_slice %84 {offsets = [0, 0], sizes = [2, 64], strides = [1, 1]} : vector<2x192xf32> to vector<2x64xf32>
    %88 = vector.extract_strided_slice %84 {offsets = [0, 64], sizes = [2, 64], strides = [1, 1]} : vector<2x192xf32> to vector<2x64xf32>
    %89 = vector.extract_strided_slice %84 {offsets = [0, 128], sizes = [2, 64], strides = [1, 1]} : vector<2x192xf32> to vector<2x64xf32>
    %90 = arith.mulf %88, %70 : vector<2x64xf32>
    %91 = arith.mulf %87, %86 : vector<2x64xf32>
    %92 = arith.addf %90, %91 : vector<2x64xf32>
    %93 = math.tanh %92 : vector<2x64xf32>
    %94 = arith.mulf %89, %93 : vector<2x64xf32>
    %95 = vector.extract_strided_slice %8 {offsets = [8, 0], sizes = [2, 256], strides = [1, 1]} : vector<16x256xf32> to vector<2x256xf32>
    %96 = arith.truncf %94 : vector<2x64xf32> to vector<2x64xbf16>
    %cst_27 = arith.constant dense<0.000000e+00> : vector<2x256xf32>
    %97 = tpu.matmul %96, %1, %cst_27 {dimension_numbers = #tpu.dot_dimension_numbers<[1], [0], [0], [1], [0, 0, 1, 1], [], []>} : vector<2x64xbf16>, vector<64x256xbf16>, vector<2x256xf32> -> vector<2x256xf32>
    %98 = arith.addf %95, %97 : vector<2x256xf32>
    %99 = vector.extract_strided_slice %98 {offsets = [0, 0], sizes = [2, 192], strides = [1, 1]} : vector<2x256xf32> to vector<2x192xf32>
    %cst_28 = arith.constant 5.000000e-01 : f32
    %100 = vector.broadcast %cst_28 : f32 to vector<2x192xf32>
    %101 = arith.mulf %100, %99 : vector<2x192xf32>
    %102 = math.tanh %101 : vector<2x192xf32>
    %cst_29 = arith.constant 5.000000e-01 : f32
    %103 = vector.broadcast %cst_29 : f32 to vector<2x192xf32>
    %104 = arith.mulf %103, %102 : vector<2x192xf32>
    %cst_30 = arith.constant 5.000000e-01 : f32
    %105 = vector.broadcast %cst_30 : f32 to vector<2x192xf32>
    %106 = arith.addf %104, %105 : vector<2x192xf32>
    %107 = vector.extract_strided_slice %98 {offsets = [0, 192], sizes = [2, 64], strides = [1, 1]} : vector<2x256xf32> to vector<2x64xf32>
    %108 = math.tanh %107 : vector<2x64xf32>
    %109 = vector.extract_strided_slice %106 {offsets = [0, 0], sizes = [2, 64], strides = [1, 1]} : vector<2x192xf32> to vector<2x64xf32>
    %110 = vector.extract_strided_slice %106 {offsets = [0, 64], sizes = [2, 64], strides = [1, 1]} : vector<2x192xf32> to vector<2x64xf32>
    %111 = vector.extract_strided_slice %106 {offsets = [0, 128], sizes = [2, 64], strides = [1, 1]} : vector<2x192xf32> to vector<2x64xf32>
    %112 = arith.mulf %110, %92 : vector<2x64xf32>
    %113 = arith.mulf %109, %108 : vector<2x64xf32>
    %114 = arith.addf %112, %113 : vector<2x64xf32>
    %115 = math.tanh %114 : vector<2x64xf32>
    %116 = arith.mulf %111, %115 : vector<2x64xf32>
    %117 = vector.extract_strided_slice %8 {offsets = [10, 0], sizes = [2, 256], strides = [1, 1]} : vector<16x256xf32> to vector<2x256xf32>
    %118 = arith.truncf %116 : vector<2x64xf32> to vector<2x64xbf16>
    %cst_31 = arith.constant dense<0.000000e+00> : vector<2x256xf32>
    %119 = tpu.matmul %118, %1, %cst_31 {dimension_numbers = #tpu.dot_dimension_numbers<[1], [0], [0], [1], [0, 0, 1, 1], [], []>} : vector<2x64xbf16>, vector<64x256xbf16>, vector<2x256xf32> -> vector<2x256xf32>
    %120 = arith.addf %117, %119 : vector<2x256xf32>
    %121 = vector.extract_strided_slice %120 {offsets = [0, 0], sizes = [2, 192], strides = [1, 1]} : vector<2x256xf32> to vector<2x192xf32>
    %cst_32 = arith.constant 5.000000e-01 : f32
    %122 = vector.broadcast %cst_32 : f32 to vector<2x192xf32>
    %123 = arith.mulf %122, %121 : vector<2x192xf32>
    %124 = math.tanh %123 : vector<2x192xf32>
    %cst_33 = arith.constant 5.000000e-01 : f32
    %125 = vector.broadcast %cst_33 : f32 to vector<2x192xf32>
    %126 = arith.mulf %125, %124 : vector<2x192xf32>
    %cst_34 = arith.constant 5.000000e-01 : f32
    %127 = vector.broadcast %cst_34 : f32 to vector<2x192xf32>
    %128 = arith.addf %126, %127 : vector<2x192xf32>
    %129 = vector.extract_strided_slice %120 {offsets = [0, 192], sizes = [2, 64], strides = [1, 1]} : vector<2x256xf32> to vector<2x64xf32>
    %130 = math.tanh %129 : vector<2x64xf32>
    %131 = vector.extract_strided_slice %128 {offsets = [0, 0], sizes = [2, 64], strides = [1, 1]} : vector<2x192xf32> to vector<2x64xf32>
    %132 = vector.extract_strided_slice %128 {offsets = [0, 64], sizes = [2, 64], strides = [1, 1]} : vector<2x192xf32> to vector<2x64xf32>
    %133 = vector.extract_strided_slice %128 {offsets = [0, 128], sizes = [2, 64], strides = [1, 1]} : vector<2x192xf32> to vector<2x64xf32>
    %134 = arith.mulf %132, %114 : vector<2x64xf32>
    %135 = arith.mulf %131, %130 : vector<2x64xf32>
    %136 = arith.addf %134, %135 : vector<2x64xf32>
    %137 = math.tanh %136 : vector<2x64xf32>
    %138 = arith.mulf %133, %137 : vector<2x64xf32>
    %139 = vector.extract_strided_slice %8 {offsets = [12, 0], sizes = [2, 256], strides = [1, 1]} : vector<16x256xf32> to vector<2x256xf32>
    %140 = arith.truncf %138 : vector<2x64xf32> to vector<2x64xbf16>
    %cst_35 = arith.constant dense<0.000000e+00> : vector<2x256xf32>
    %141 = tpu.matmul %140, %1, %cst_35 {dimension_numbers = #tpu.dot_dimension_numbers<[1], [0], [0], [1], [0, 0, 1, 1], [], []>} : vector<2x64xbf16>, vector<64x256xbf16>, vector<2x256xf32> -> vector<2x256xf32>
    %142 = arith.addf %139, %141 : vector<2x256xf32>
    %143 = vector.extract_strided_slice %142 {offsets = [0, 0], sizes = [2, 192], strides = [1, 1]} : vector<2x256xf32> to vector<2x192xf32>
    %cst_36 = arith.constant 5.000000e-01 : f32
    %144 = vector.broadcast %cst_36 : f32 to vector<2x192xf32>
    %145 = arith.mulf %144, %143 : vector<2x192xf32>
    %146 = math.tanh %145 : vector<2x192xf32>
    %cst_37 = arith.constant 5.000000e-01 : f32
    %147 = vector.broadcast %cst_37 : f32 to vector<2x192xf32>
    %148 = arith.mulf %147, %146 : vector<2x192xf32>
    %cst_38 = arith.constant 5.000000e-01 : f32
    %149 = vector.broadcast %cst_38 : f32 to vector<2x192xf32>
    %150 = arith.addf %148, %149 : vector<2x192xf32>
    %151 = vector.extract_strided_slice %142 {offsets = [0, 192], sizes = [2, 64], strides = [1, 1]} : vector<2x256xf32> to vector<2x64xf32>
    %152 = math.tanh %151 : vector<2x64xf32>
    %153 = vector.extract_strided_slice %150 {offsets = [0, 0], sizes = [2, 64], strides = [1, 1]} : vector<2x192xf32> to vector<2x64xf32>
    %154 = vector.extract_strided_slice %150 {offsets = [0, 64], sizes = [2, 64], strides = [1, 1]} : vector<2x192xf32> to vector<2x64xf32>
    %155 = vector.extract_strided_slice %150 {offsets = [0, 128], sizes = [2, 64], strides = [1, 1]} : vector<2x192xf32> to vector<2x64xf32>
    %156 = arith.mulf %154, %136 : vector<2x64xf32>
    %157 = arith.mulf %153, %152 : vector<2x64xf32>
    %158 = arith.addf %156, %157 : vector<2x64xf32>
    %159 = math.tanh %158 : vector<2x64xf32>
    %160 = arith.mulf %155, %159 : vector<2x64xf32>
    %161 = vector.extract_strided_slice %8 {offsets = [14, 0], sizes = [2, 256], strides = [1, 1]} : vector<16x256xf32> to vector<2x256xf32>
    %162 = arith.truncf %160 : vector<2x64xf32> to vector<2x64xbf16>
    %cst_39 = arith.constant dense<0.000000e+00> : vector<2x256xf32>
    %163 = tpu.matmul %162, %1, %cst_39 {dimension_numbers = #tpu.dot_dimension_numbers<[1], [0], [0], [1], [0, 0, 1, 1], [], []>} : vector<2x64xbf16>, vector<64x256xbf16>, vector<2x256xf32> -> vector<2x256xf32>
    %164 = arith.addf %161, %163 : vector<2x256xf32>
    %165 = vector.extract_strided_slice %164 {offsets = [0, 0], sizes = [2, 192], strides = [1, 1]} : vector<2x256xf32> to vector<2x192xf32>
    %cst_40 = arith.constant 5.000000e-01 : f32
    %166 = vector.broadcast %cst_40 : f32 to vector<2x192xf32>
    %167 = arith.mulf %166, %165 : vector<2x192xf32>
    %168 = math.tanh %167 : vector<2x192xf32>
    %cst_41 = arith.constant 5.000000e-01 : f32
    %169 = vector.broadcast %cst_41 : f32 to vector<2x192xf32>
    %170 = arith.mulf %169, %168 : vector<2x192xf32>
    %cst_42 = arith.constant 5.000000e-01 : f32
    %171 = vector.broadcast %cst_42 : f32 to vector<2x192xf32>
    %172 = arith.addf %170, %171 : vector<2x192xf32>
    %173 = vector.extract_strided_slice %164 {offsets = [0, 192], sizes = [2, 64], strides = [1, 1]} : vector<2x256xf32> to vector<2x64xf32>
    %174 = math.tanh %173 : vector<2x64xf32>
    %175 = vector.extract_strided_slice %172 {offsets = [0, 0], sizes = [2, 64], strides = [1, 1]} : vector<2x192xf32> to vector<2x64xf32>
    %176 = vector.extract_strided_slice %172 {offsets = [0, 64], sizes = [2, 64], strides = [1, 1]} : vector<2x192xf32> to vector<2x64xf32>
    %177 = vector.extract_strided_slice %172 {offsets = [0, 128], sizes = [2, 64], strides = [1, 1]} : vector<2x192xf32> to vector<2x64xf32>
    %178 = arith.mulf %176, %158 : vector<2x64xf32>
    %179 = arith.mulf %175, %174 : vector<2x64xf32>
    %180 = arith.addf %178, %179 : vector<2x64xf32>
    %181 = math.tanh %180 : vector<2x64xf32>
    %182 = arith.mulf %177, %181 : vector<2x64xf32>
    %cst_43 = arith.constant dense<0.000000e+00> : vector<2x128xf32>
    %183 = tpu.matmul %182, %3, %cst_43 {dimension_numbers = #tpu.dot_dimension_numbers<[1], [0], [0], [1], [0, 0, 1, 1], [], []>} : vector<2x64xf32>, vector<64x128xf32>, vector<2x128xf32> -> vector<2x128xf32>
    %184 = vector.broadcast %4 : vector<1x128xf32> to vector<2x128xf32>
    %185 = arith.addf %183, %184 : vector<2x128xf32>
    %c0_44 = arith.constant 0 : index
    %c0_45 = arith.constant 0 : index
    %186 = vector.load %arg6[%c0_44, %c0_45] : memref<2x128xf32, #tpu.memory_space<vmem>>, vector<2x128xf32>
    tpu.vector_store %arg6[%c0_44, %c0_45], %185 {strides = array<i32>} : memref<2x128xf32, #tpu.memory_space<vmem>>, vector<2x128xf32>,
    return
  }
}

</mosaic_0001>

<bundles_post_ra>
// kernel: rnn_forward.1
= control target key start
LH: loop header
LB: loop body
LE: loop exit
PB: predicated region body
PF: predicated region fallthrough
CT: control target
= control target key end

     0   :  { %11 = vsyncpa [#allocation3], 0  ;;  %s1206_s0 = inlined_call_operand.vmem [shape: bf16[16,28], index: 0, kind: input, shape index: {}]   ;;  %s1207_s1 = inlined_call_operand.vmem [shape: bf16[28,256], index: 1, kind: input, shape index: {}]   ;;  %s1208_s2 = inlined_call_operand.hbm [shape: bf16[64,256], index: 2, kind: input, shape index: {}]   ;;  %s1209_s3 = inlined_call_operand.vmem [shape: f32[1,256], index: 3, kind: input, shape index: {}]   ;;  %s1210_s4 = inlined_call_operand.hbm [shape: f32[64,128], index: 4, kind: input, shape index: {}]   ;;  %s1211_s5 = inlined_call_operand.vmem [shape: f32[1,128], index: 5, kind: input, shape index: {}]   ;;  %s1212_s6 = inlined_call_operand.hbm [shape: f32[2,128], index: 6, kind: output, shape index: {}]  }
   0x1   :  { %12 = vsyncpa [#allocation6], 0 }
   0x2   :  { %13 = vsyncpa [#allocation4], 0  ;;  %s22_s23 = sshll.u32 %s1208_s2, 4  ;;  %s965_s24 = smov [#allocation2]   ;;  %s23_s23 = int_to_ptr.hbm [resolvable:$true] %s22_s23 }
   0x3   :  { %s24_s25 = sshll.u32 %s965_s24, 4  ;;  %s37_s28 = sshll.u32 %s1210_s4, 4  ;;  %s25_s25 = int_to_ptr.vmem [resolvable:$true] %s24_s25  ;;  %s38_s28 = int_to_ptr.hbm [resolvable:$true] %s37_s28 }
   0x4   :  { %s966_s29 = smov 128   ;;  %s967_s30 = smov 8  }
   0x5   :  { %30 = dma.hbm_to_vmem [thread:$0]  %s23_s23, 1024, %s25_s25, [#allocation3], %s966_s29, %s966_s29, %s967_s30  }
   0x6   :  { %s968_s7 = smov [#allocation5]  }
   0x7   :  { %s39_s8 = sshll.u32 %s968_s7, 4  ;;  %s40_s8 = int_to_ptr.vmem [resolvable:$true] %s39_s8 }
   0x8   :  { %45 = dma.hbm_to_vmem [thread:$0]  %s38_s28, 1024, %s40_s8, [#allocation6], %s966_s29, %s966_s29, %s967_s30  }
   0x9   :  { %959 = dma.done.wait [#allocation3], 1024  }
   0xa   :  { %960 = vsyncadd [#allocation3], 4294966272 }
   0xb   :  { %961 = dma.done.wait [#allocation6], 1024  }
   0xc   :  { %962 = vsyncadd [#allocation6], 4294966272  ;;  %v805_v0 = vld [vmem:[%s1207_s1 + $0x14] sm:$0xf]  ;;  %v750_v1 = vld [vmem:[%s1207_s1 + $0x18] sm:$0x30] }
   0xd   :  { %vm113_vm0 = vcmask 1045504   ;;  %v753_v2 = vor.u32 %v805_v0, %v750_v1  ;;  %v803_v3 = vld [vmem:[%s1207_s1 + $0x4] sm:$0xf]  ;;  %v742_v4 = vld [vmem:[%s1207_s1 + $0x8] sm:$0xf0]  ;;  %vm109_vm1 = vcmask 228352  }
   0xe   :  { %v748_v5 = vld [vmem:[%s1207_s1 + $0x10] sm:$0xf]  ;;  %v806_v6 = vld [vmem:[%s1207_s1 + $0x14] sm:$0x30]  ;;  %v740_v7 = vld [vmem:[%s1207_s1] sm:$0xf]  ;;  %v745_v11 = vor.u32 %v803_v3, %v742_v4 }
   0xf   :  { %v118_v8 = vsel %vm113_vm0, %v753_v2, 0  ;;  %v749_v9 = vor.u32 %v806_v6, %v748_v5  ;;  %v804_v10 = vld [vmem:[%s1207_s1 + $0x4] sm:$0xf0]  ;;  %v815_v14 = vld [vmem:[%s1206_s0] sm:$0xff]  ;;  %s969_s0 = smov 64   ;;  %vm215_vm2 = vcmask 523264  }
  0x10   :  { %140 = vmatpush.bf16.msra.mxu1 %v118_v8  ;;  %v741_v13 = vor.u32 %v804_v10, %v740_v7  ;;  %v1042_v15 = vld [vmem:[%s1209_s3] sm:$0x3]  ;;  %v782_v29 = vld [vmem:[#allocation2 + $0x30] sm:$0xf]  ;;  %v814_v30 = vld [vmem:[#allocation2 + $0x34] sm:$0xf0] }
  0x11   :  { %v115_v12 = vsel %vm113_vm0, %v749_v9, 0  ;;  %v83_v16 = vperm.slane %v1042_v15, 1  ;;  %v82_v20 = vperm.slane %v1042_v15, 0  ;;  %v813_v31 = vld [vmem:[#allocation2 + $0x34] sm:$0xf]  ;;  %v1058_v32 = vor.u32 %v814_v30, %v782_v29  ;;  %s970_s27 = smov [#allocation7]  }
  0x12   :  { %126 = vmatpush.bf16.msra.mxu0 %v115_v12  ;;  %v784_v33 = vld [vmem:[#allocation2 + $0x38] sm:$0xf0]  ;;  %v774_v34 = vld [vmem:[#allocation2 + $0x20] sm:$0xf]  ;;  %v812_v35 = vld [vmem:[#allocation2 + $0x24] sm:$0xf0] }
  0x13   :  { %v1060_v36 = vor.u32 %v813_v31, %v784_v33  ;;  %v811_v37 = vld [vmem:[#allocation2 + $0x24] sm:$0xf]  ;;  %v776_v38 = vld [vmem:[#allocation2 + $0x28] sm:$0xf0]  ;;  %223 = vmatpush.bf16.msra.mxu2 %v1058_v32  ;;  %v1063_v39 = vor.u32 %v812_v35, %v774_v34  ;;  %v766_v41 = vld [vmem:[#allocation2 + $0x10] sm:$0xf] }
  0x14   :  { %141 = vmatpush.bf16.msra.mxu1 %v745_v11  ;;  %v1067_v40 = vor.u32 %v811_v37, %v776_v38  ;;  %v810_v42 = vld [vmem:[#allocation2 + $0x14] sm:$0xf0]  ;;  %v809_v43 = vld [vmem:[#allocation2 + $0x14] sm:$0xf]  ;;  %v768_v44 = vld [vmem:[#allocation2 + $0x18] sm:$0xf0] }
  0x15   :  { %236 = vmatpush.bf16.msra.mxu3 %v1060_v36  ;;  %v1071_v45 = vor.u32 %v810_v42, %v766_v41  ;;  %v1075_v46 = vor.u32 %v809_v43, %v768_v44  ;;  %v758_v51 = vld [vmem:[#allocation2] sm:$0xf]  ;;  %v808_v52 = vld [vmem:[#allocation2 + $0x4] sm:$0xf0]  ;;  %v807_v53 = vld [vmem:[#allocation2 + $0x4] sm:$0xf] }
  0x16   :  { %127 = vmatpush.bf16.msra.mxu0 %v741_v13  ;;  %v1086_v54 = vor.u32 %v808_v52, %v758_v51  ;;  %v760_v55 = vld [vmem:[#allocation2 + $0x8] sm:$0xf0]  ;;  %s721_s28 = sshll.u32 %s970_s27, 4  ;;  %s723_s7 = sshll.u32 %s1212_s6, 4  ;;  %s722_s28 = int_to_ptr.vmem [resolvable:$true] %s721_s28  ;;  %s724_s7 = int_to_ptr.hbm [resolvable:$true] %s723_s7 }
  0x17   :  { %755 = vmatmul.msk.bf16.vlgmr.msra.gmra.mxu1 %vm109_vm1, %v815_v14  ;;  %224 = vmatpush.bf16.msra.mxu2 %v1063_v39  ;;  %v1088_v56 = vor.u32 %v807_v53, %v760_v55 }
  0x18   :  { %305 = vmatpush.bf16.msrb.mxu1 %v1060_v36 }
  0x19   :  { %754 = vmatmul.msk.bf16.vlgmr.msra.gmra.mxu0 %vm109_vm1, %v815_v14  ;;  %237 = vmatpush.bf16.msra.mxu3 %v1067_v40 }
  0x1a   :  { %292 = vmatpush.bf16.msrb.mxu0 %v1058_v32 }
  0x1b   :  { %225 = vmatpush.bf16.msra.mxu2 %v1071_v45 }
  0x1c   :  { %306 = vmatpush.bf16.msrb.mxu1 %v1067_v40 }
  0x1d   :  { %238 = vmatpush.bf16.msra.mxu3 %v1075_v46 }
  0x1e   :  { %293 = vmatpush.bf16.msrb.mxu0 %v1063_v39 }
  0x1f   :  { %226 = vmatpush.bf16.msra.mxu2 %v1086_v54 }
  0x20   :  { %307 = vmatpush.bf16.msrb.mxu1 %v1075_v46 }
  0x21   :  { %239 = vmatpush.bf16.msra.mxu3 %v1088_v56 }
  0x22   :  { %294 = vmatpush.bf16.msrb.mxu0 %v1071_v45 }
  0x23   :  { %361 = vmatpush.bf16.msrb.mxu2 %v1058_v32 }
  0x24   :  { %308 = vmatpush.bf16.msrb.mxu1 %v1088_v56 }
  0x25   :  { %374 = vmatpush.bf16.msrb.mxu3 %v1060_v36 }
  0x26   :  { %295 = vmatpush.bf16.msrb.mxu0 %v1086_v54 }
  0x27   :  { %362 = vmatpush.bf16.msrb.mxu2 %v1063_v39 }
  0x28   :  { %443 = vmatpush.bf16.msra.mxu1 %v1060_v36 }
  0x29   :  { %375 = vmatpush.bf16.msrb.mxu3 %v1067_v40 }
  0x2a   :  { %430 = vmatpush.bf16.msra.mxu0 %v1058_v32 }
  0x2b   :  { %363 = vmatpush.bf16.msrb.mxu2 %v1071_v45 }
  0x2c   :  { %444 = vmatpush.bf16.msra.mxu1 %v1067_v40 }
  0x2d   :  { %376 = vmatpush.bf16.msrb.mxu3 %v1075_v46 }
  0x2e   :  { %431 = vmatpush.bf16.msra.mxu0 %v1063_v39 }
  0x2f   :  { %364 = vmatpush.bf16.msrb.mxu2 %v1086_v54 }
  0x30   :  { %445 = vmatpush.bf16.msra.mxu1 %v1075_v46 }
  0x31   :  { %377 = vmatpush.bf16.msrb.mxu3 %v1088_v56 }
  0x32   :  { %432 = vmatpush.bf16.msra.mxu0 %v1071_v45 }
  0x34   :  { %446 = vmatpush.bf16.msra.mxu1 %v1088_v56 }
  0x36   :  { %433 = vmatpush.bf16.msra.mxu0 %v1086_v54 }
  0x94   :  { %v143_v17 = vpop.f32.mrf.mxu1 }
  0x95   :  { %v1047_v18 = vadd.f32 %v143_v17, %v83_v16 }
  0x96   :  { %v129_v21 = vpop.f32.mrf.mxu0 }
  0x97   :  { %823 = vtanh.f32 %v1047_v18  ;;  %v1054_v22 = vadd.f32 %v129_v21, %v82_v20  ;;  %v149_v57 = vmul.f32 0.5, %v1047_v18 }
  0x99   :  { %v148_v23 = vmul.f32 0.5, %v1054_v22 }
  0x9b   :  { %825 = vtanh.f32 %v148_v23 }
  0x9c   :  { %v1137_v34 = vpop.f32.mrf.mxu1 }
  0x9d   :  { %v824_v19 = vpop.eup %823 }
  0x9e   :  { %159 = vrot.lane.b32.xlu0 %v824_v19, %s969_s0  ;;  %v1139_v35 = vpop.f32.mrf.mxu0 }
  0xa1   :  { %v826_v24 = vpop.eup %825 }
  0xa2   :  { %v152_v25 = vmul.f32 0.5, %v826_v24 }
  0xa4   :  { %v154_v26 = vadd.f32 0.5, %v152_v25 }
  0xa6   :  { %v157_v47 = vmul.f32 0.0, %v154_v26 }
 0x110   :  { %v160_v27 = vpop.permute.xlu0 %159 }
 0x111   :  { %v162_v28 = vmul.f32 %v160_v27, %v154_v26 }
 0x113   :  { %164 = vrot.lane.b32.xlu0 %v162_v28, %s969_s0 }
 0x185   :  { %v165_v48 = vpop.permute.xlu0 %164 }
 0x186   :  { %v1082_v49 = vadd.f32 %v165_v48, %v157_v47 }
 0x188   :  { %827 = vtanh.f32 %v1082_v49  ;;  %v263_v17 = vrot.slane %v1082_v49, 6 }
 0x189   :  { %829 = vtanh.f32 %v149_v57 }
 0x18e   :  { %v828_v50 = vpop.eup %827 }
 0x18f   :  { %170 = vrot.lane.b32.xlu1 %v828_v50, %s969_s0  ;;  %v830_v58 = vpop.eup %829 }
 0x190   :  { %v153_v59 = vmul.f32 0.5, %v830_v58 }
 0x192   :  { %v155_v60 = vadd.f32 0.5, %v153_v59 }
 0x201   :  { %v171_v61 = vpop.permute.xlu1 %170 }
 0x202   :  { %v173_v62 = vmul.f32 %v171_v61, %v155_v60 }
 0x204   :  { %v174_v63 = vpack.c.bf16 %v173_v62, %v173_v62 }
 0x206   :  { %788 = vmatmul.msk.bf16.vlgmr.msra.gmra.mxu2 %vm215_vm2, %v174_v63  ;;  %789 = vmatmul.msk.bf16.vlgmr.msra.gmra.mxu3 %vm215_vm2, %v174_v63 }
 0x207   :  { %504 = vmatpush.bf16.msra.mxu3 %v1060_v36  ;;  %491 = vmatpush.bf16.msra.mxu2 %v1058_v32 }
 0x20b   :  { %505 = vmatpush.bf16.msra.mxu3 %v1067_v40  ;;  %492 = vmatpush.bf16.msra.mxu2 %v1063_v39 }
 0x20f   :  { %506 = vmatpush.bf16.msra.mxu3 %v1075_v46  ;;  %493 = vmatpush.bf16.msra.mxu2 %v1071_v45 }
 0x213   :  { %507 = vmatpush.bf16.msra.mxu3 %v1088_v56  ;;  %494 = vmatpush.bf16.msra.mxu2 %v1086_v54 }
 0x289   :  { %v228_v0 = vpop.f32.mrf.mxu2  ;;  %v241_v1 = vpop.f32.mrf.mxu3 }
 0x28a   :  { %v248_v2 = vrot.slane %v241_v1, 6  ;;  %v247_v7 = vrot.slane %v228_v0, 6 }
 0x28c   :  { %v252_v3 = vadd.f32 %v248_v2, %v1047_v18  ;;  %v251_v8 = vadd.f32 %v247_v7, %v1054_v22 }
 0x28e   :  { %831 = vtanh.f32 %v252_v3  ;;  %v253_v9 = vmul.f32 0.5, %v251_v8  ;;  %v254_v25 = vmul.f32 0.5, %v252_v3 }
 0x290   :  { %833 = vtanh.f32 %v253_v9 }
 0x291   :  { %v230_v4 = vpop.f32.mrf.mxu2  ;;  %v243_v5 = vpop.f32.mrf.mxu3 }
 0x294   :  { %v832_v6 = vpop.eup %831 }
 0x295   :  { %267 = vrot.lane.b32.xlu1 %v832_v6, %s969_s0 }
 0x296   :  { %v834_v10 = vpop.eup %833 }
 0x297   :  { %v257_v11 = vmul.f32 0.5, %v834_v10 }
 0x299   :  { %v259_v12 = vadd.f32 0.5, %v257_v11 }
 0x29b   :  { %v265_v19 = vmul.f32 %v263_v17, %v259_v12 }
 0x307   :  { %v268_v13 = vpop.permute.xlu1 %267 }
 0x308   :  { %v270_v14 = vmul.f32 %v268_v13, %v259_v12 }
 0x30a   :  { %272 = vrot.lane.b32.xlu2 %v270_v14, %s969_s0 }
 0x364   :  { %v273_v21 = vpop.permute.xlu2 %272 }
 0x365   :  { %v275_v23 = vadd.f32 %v273_v21, %v265_v19 }
 0x367   :  { %835 = vtanh.f32 %v275_v23  ;;  %v332_v58 = vrot.slane %v275_v23, 6 }
 0x368   :  { %837 = vtanh.f32 %v254_v25 }
 0x36d   :  { %v836_v24 = vpop.eup %835 }
 0x36e   :  { %278 = vrot.lane.b32.xlu2 %v836_v24, %s969_s0  ;;  %v838_v26 = vpop.eup %837 }
 0x36f   :  { %v258_v27 = vmul.f32 0.5, %v838_v26 }
 0x371   :  { %v260_v28 = vadd.f32 0.5, %v258_v27 }
 0x3c8   :  { %v279_v29 = vpop.permute.xlu2 %278 }
 0x3c9   :  { %v281_v30 = vmul.f32 %v279_v29, %v260_v28 }
 0x3cb   :  { %v282_v31 = vpack.c.bf16 %v281_v30, %v281_v30  ;;  %v1166_v30 = vadd.f32 %v1137_v34, %v83_v16 }
 0x3cd   :  { %v284_v33 = vrot.slane %v282_v31, 1 }
 0x3cf   :  { %790 = vmatmul.msk.bf16.vlgmr.msrb.gmra.mxu0 %vm215_vm2, %v284_v33  ;;  %791 = vmatmul.msk.bf16.vlgmr.msrb.gmra.mxu1 %vm215_vm2, %v284_v33 }
 0x3d0   :  { %573 = vmatpush.bf16.msrb.mxu1 %v1060_v36  ;;  %560 = vmatpush.bf16.msrb.mxu0 %v1058_v32 }
 0x3d4   :  { %574 = vmatpush.bf16.msrb.mxu1 %v1067_v40  ;;  %561 = vmatpush.bf16.msrb.mxu0 %v1063_v39 }
 0x3d8   :  { %575 = vmatpush.bf16.msrb.mxu1 %v1075_v46  ;;  %562 = vmatpush.bf16.msrb.mxu0 %v1071_v45 }
 0x3dc   :  { %576 = vmatpush.bf16.msrb.mxu1 %v1088_v56  ;;  %563 = vmatpush.bf16.msrb.mxu0 %v1086_v54 }
 0x44c   :  { %v297_v37 = vpop.f32.mrf.mxu0  ;;  %v310_v38 = vpop.f32.mrf.mxu1 }
 0x44d   :  { %v317_v41 = vrot.slane %v310_v38, 4  ;;  %v316_v48 = vrot.slane %v297_v37, 4 }
 0x44f   :  { %v321_v42 = vadd.f32 %v317_v41, %v1047_v18  ;;  %v320_v49 = vadd.f32 %v316_v48, %v1054_v22 }
 0x451   :  { %839 = vtanh.f32 %v321_v42  ;;  %v322_v50 = vmul.f32 0.5, %v320_v49  ;;  %v323_v63 = vmul.f32 0.5, %v321_v42 }
 0x453   :  { %841 = vtanh.f32 %v322_v50 }
 0x454   :  { %v299_v43 = vpop.f32.mrf.mxu0  ;;  %v312_v44 = vpop.f32.mrf.mxu1 }
 0x455   :  { %v1173_v43 = vadd.f32 %v1139_v35, %v82_v20 }
 0x457   :  { %v840_v47 = vpop.eup %839 }
 0x458   :  { %336 = vrot.lane.b32.xlu0 %v840_v47, %s969_s0 }
 0x459   :  { %v842_v51 = vpop.eup %841 }
 0x45a   :  { %v326_v52 = vmul.f32 0.5, %v842_v51 }
 0x45c   :  { %v328_v53 = vadd.f32 0.5, %v326_v52 }
 0x45e   :  { %v334_v59 = vmul.f32 %v332_v58, %v328_v53 }
 0x4ca   :  { %v337_v55 = vpop.permute.xlu0 %336 }
 0x4cb   :  { %v339_v57 = vmul.f32 %v337_v55, %v328_v53 }
 0x4cd   :  { %341 = vrot.lane.b32.xlu1 %v339_v57, %s969_s0 }
 0x53f   :  { %v342_v60 = vpop.permute.xlu1 %341 }
 0x540   :  { %v344_v61 = vadd.f32 %v342_v60, %v334_v59 }
 0x542   :  { %843 = vtanh.f32 %v344_v61  ;;  %v401_v14 = vrot.slane %v344_v61, 6 }
 0x543   :  { %845 = vtanh.f32 %v323_v63 }
 0x548   :  { %v844_v62 = vpop.eup %843 }
 0x549   :  { %347 = vrot.lane.b32.xlu2 %v844_v62, %s969_s0  ;;  %v846_v0 = vpop.eup %845 }
 0x54a   :  { %v327_v1 = vmul.f32 0.5, %v846_v0 }
 0x54c   :  { %v329_v2 = vadd.f32 0.5, %v327_v1 }
 0x5a3   :  { %v348_v3 = vpop.permute.xlu2 %347 }
 0x5a4   :  { %v350_v4 = vmul.f32 %v348_v3, %v329_v2 }
 0x5a6   :  { %v351_v5 = vpack.c.bf16 %v350_v4, %v350_v4 }
 0x5a8   :  { %v353_v6 = vrot.slane %v351_v5, 2 }
 0x5aa   :  { %792 = vmatmul.msk.bf16.vlgmr.msrb.gmra.mxu2 %vm215_vm2, %v353_v6  ;;  %793 = vmatmul.msk.bf16.vlgmr.msrb.gmra.mxu3 %vm215_vm2, %v353_v6 }
 0x5ab   :  { %642 = vmatpush.bf16.msrb.mxu3 %v1060_v36  ;;  %629 = vmatpush.bf16.msrb.mxu2 %v1058_v32 }
 0x5af   :  { %643 = vmatpush.bf16.msrb.mxu3 %v1067_v40  ;;  %630 = vmatpush.bf16.msrb.mxu2 %v1063_v39 }
 0x5b3   :  { %644 = vmatpush.bf16.msrb.mxu3 %v1075_v46  ;;  %631 = vmatpush.bf16.msrb.mxu2 %v1071_v45 }
 0x5b7   :  { %645 = vmatpush.bf16.msrb.mxu3 %v1088_v56  ;;  %632 = vmatpush.bf16.msrb.mxu2 %v1086_v54 }
 0x62d   :  { %v366_v7 = vpop.f32.mrf.mxu2  ;;  %v379_v8 = vpop.f32.mrf.mxu3 }
 0x62e   :  { %v386_v9 = vrot.slane %v379_v8, 2  ;;  %v385_v39 = vrot.slane %v366_v7, 2 }
 0x630   :  { %v390_v10 = vadd.f32 %v386_v9, %v1047_v18  ;;  %v389_v40 = vadd.f32 %v385_v39, %v1054_v22 }
 0x632   :  { %847 = vtanh.f32 %v390_v10  ;;  %v391_v46 = vmul.f32 0.5, %v389_v40  ;;  %v392_v23 = vmul.f32 0.5, %v390_v10 }
 0x634   :  { %849 = vtanh.f32 %v391_v46 }
 0x635   :  { %v368_v36 = vpop.f32.mrf.mxu2  ;;  %v381_v32 = vpop.f32.mrf.mxu3 }
 0x638   :  { %v848_v11 = vpop.eup %847 }
 0x639   :  { %405 = vrot.lane.b32.xlu0 %v848_v11, %s969_s0 }
 0x63a   :  { %v850_v45 = vpop.eup %849 }
 0x63b   :  { %v395_v56 = vmul.f32 0.5, %v850_v45 }
 0x63d   :  { %v397_v12 = vadd.f32 0.5, %v395_v56 }
 0x63f   :  { %v403_v18 = vmul.f32 %v401_v14, %v397_v12 }
 0x6ab   :  { %v406_v54 = vpop.permute.xlu0 %405 }
 0x6ac   :  { %v408_v13 = vmul.f32 %v406_v54, %v397_v12 }
 0x6ae   :  { %410 = vrot.lane.b32.xlu1 %v408_v13, %s969_s0 }
 0x720   :  { %v411_v17 = vpop.permute.xlu1 %410 }
 0x721   :  { %v413_v19 = vadd.f32 %v411_v17, %v403_v18 }
 0x723   :  { %851 = vtanh.f32 %v413_v19  ;;  %v464_v51 = vrot.slane %v413_v19, 6 }
 0x724   :  { %853 = vtanh.f32 %v392_v23 }
 0x729   :  { %v852_v21 = vpop.eup %851 }
 0x72a   :  { %416 = vrot.lane.b32.xlu2 %v852_v21, %s969_s0  ;;  %v854_v22 = vpop.eup %853 }
 0x72b   :  { %v396_v24 = vmul.f32 0.5, %v854_v22 }
 0x72d   :  { %v398_v25 = vadd.f32 0.5, %v396_v24 }
 0x784   :  { %v417_v26 = vpop.permute.xlu2 %416 }
 0x785   :  { %v419_v27 = vmul.f32 %v417_v26, %v398_v25 }
 0x787   :  { %v420_v28 = vpack.c.bf16 %v419_v27, %v419_v27 }
 0x789   :  { %v422_v29 = vrot.slane %v420_v28, 3 }
 0x78b   :  { %794 = vmatmul.msk.bf16.vlgmr.msra.gmra.mxu0 %vm215_vm2, %v422_v29  ;;  %795 = vmatmul.msk.bf16.vlgmr.msra.gmra.mxu1 %vm215_vm2, %v422_v29 }
 0x808   :  { %v435_v31 = vpop.f32.mrf.mxu0  ;;  %v448_v33 = vpop.f32.mrf.mxu1 }
 0x809   :  { %v453_v37 = vadd.f32 %v448_v33, %v1166_v30  ;;  %v452_v44 = vadd.f32 %v435_v31, %v1173_v43 }
 0x80b   :  { %855 = vtanh.f32 %v453_v37  ;;  %v454_v47 = vmul.f32 0.5, %v452_v44  ;;  %v455_v20 = vmul.f32 0.5, %v453_v37 }
 0x80d   :  { %857 = vtanh.f32 %v454_v47 }
 0x810   :  { %v437_v38 = vpop.f32.mrf.mxu0  ;;  %v450_v41 = vpop.f32.mrf.mxu1 }
 0x811   :  { %v856_v42 = vpop.eup %855 }
 0x812   :  { %468 = vrot.lane.b32.xlu0 %v856_v42, %s969_s0 }
 0x813   :  { %v858_v16 = vpop.eup %857 }
 0x814   :  { %v458_v34 = vmul.f32 0.5, %v858_v16 }
 0x816   :  { %v460_v48 = vadd.f32 0.5, %v458_v34 }
 0x818   :  { %v466_v52 = vmul.f32 %v464_v51, %v460_v48 }
 0x884   :  { %v469_v49 = vpop.permute.xlu0 %468 }
 0x885   :  { %v471_v50 = vmul.f32 %v469_v49, %v460_v48 }
 0x887   :  { %473 = vrot.lane.b32.xlu1 %v471_v50, %s969_s0 }
 0x8f9   :  { %v474_v53 = vpop.permute.xlu1 %473 }
 0x8fa   :  { %v476_v55 = vadd.f32 %v474_v53, %v466_v52 }
 0x8fc   :  { %859 = vtanh.f32 %v476_v55  ;;  %v531_v11 = vrot.slane %v476_v55, 6 }
 0x8fd   :  { %861 = vtanh.f32 %v455_v20 }
 0x902   :  { %v860_v15 = vpop.eup %859 }
 0x903   :  { %479 = vrot.lane.b32.xlu2 %v860_v15, %s969_s0  ;;  %v862_v35 = vpop.eup %861 }
 0x904   :  { %v459_v57 = vmul.f32 0.5, %v862_v35 }
 0x906   :  { %v461_v58 = vadd.f32 0.5, %v459_v57 }
 0x95d   :  { %v480_v59 = vpop.permute.xlu2 %479 }
 0x95e   :  { %v482_v60 = vmul.f32 %v480_v59, %v461_v58 }
 0x960   :  { %v483_v61 = vpack.c.bf16 %v482_v60, %v482_v60 }
 0x962   :  { %796 = vmatmul.msk.bf16.vlgmr.msra.gmra.mxu2 %vm215_vm2, %v483_v61  ;;  %797 = vmatmul.msk.bf16.vlgmr.msra.gmra.mxu3 %vm215_vm2, %v483_v61 }
 0x9e5   :  { %v496_v62 = vpop.f32.mrf.mxu2  ;;  %v509_v63 = vpop.f32.mrf.mxu3 }
 0x9e6   :  { %v516_v0 = vrot.slane %v509_v63, 6  ;;  %v515_v5 = vrot.slane %v496_v62, 6 }
 0x9e8   :  { %v520_v1 = vadd.f32 %v516_v0, %v1166_v30  ;;  %v519_v6 = vadd.f32 %v515_v5, %v1173_v43 }
 0x9ea   :  { %863 = vtanh.f32 %v520_v1  ;;  %v521_v7 = vmul.f32 0.5, %v519_v6  ;;  %v522_v56 = vmul.f32 0.5, %v520_v1 }
 0x9ec   :  { %865 = vtanh.f32 %v521_v7  ;;  %v77_v7 = vld [vmem:[#allocation5 + $0x38] sm:$0xff] }
 0x9ed   :  { %v498_v2 = vpop.f32.mrf.mxu2  ;;  %v511_v3 = vpop.f32.mrf.mxu3  ;;  %703 = vmatpush.msra.mxu0 %v77_v7 }
 0x9f0   :  { %v864_v4 = vpop.eup %863 }
 0x9f1   :  { %535 = vrot.lane.b32.xlu0 %v864_v4, %s969_s0 }
 0x9f2   :  { %v866_v8 = vpop.eup %865 }
 0x9f3   :  { %v525_v9 = vmul.f32 0.5, %v866_v8  ;;  %v75_v8 = vld [vmem:[#allocation5 + $0x28] sm:$0xff] }
 0x9f5   :  { %v527_v10 = vadd.f32 0.5, %v525_v9  ;;  %v74_v9 = vld [vmem:[#allocation5 + $0x20] sm:$0xff] }
 0x9f7   :  { %v533_v39 = vmul.f32 %v531_v11, %v527_v10 }
 0xa63   :  { %v536_v36 = vpop.permute.xlu0 %535 }
 0xa64   :  { %v538_v32 = vmul.f32 %v536_v36, %v527_v10  ;;  %v73_v10 = vld [vmem:[#allocation5 + $0x18] sm:$0xff]  ;;  %v72_v36 = vld [vmem:[#allocation5 + $0x10] sm:$0xff] }
 0xa66   :  { %540 = vrot.lane.b32.xlu1 %v538_v32, %s969_s0 }
 0xad8   :  { %v541_v40 = vpop.permute.xlu1 %540 }
 0xad9   :  { %v543_v46 = vadd.f32 %v541_v40, %v533_v39 }
 0xadb   :  { %867 = vtanh.f32 %v543_v46  ;;  %v600_v44 = vrot.slane %v543_v46, 6  ;;  %v71_v46 = vld [vmem:[#allocation5 + $0x8] sm:$0xff] }
 0xadc   :  { %869 = vtanh.f32 %v522_v56 }
 0xae1   :  { %v868_v45 = vpop.eup %867 }
 0xae2   :  { %546 = vrot.lane.b32.xlu2 %v868_v45, %s969_s0  ;;  %v870_v12 = vpop.eup %869  ;;  %v70_v45 = vld [vmem:[#allocation5] sm:$0xff] }
 0xae3   :  { %v526_v54 = vmul.f32 0.5, %v870_v12 }
 0xae5   :  { %v528_v13 = vadd.f32 0.5, %v526_v54 }
 0xb3c   :  { %v547_v14 = vpop.permute.xlu2 %546 }
 0xb3d   :  { %v549_v18 = vmul.f32 %v547_v14, %v528_v13 }
 0xb3f   :  { %v550_v17 = vpack.c.bf16 %v549_v18, %v549_v18 }
 0xb41   :  { %v552_v19 = vrot.slane %v550_v17, 1 }
 0xb43   :  { %798 = vmatmul.msk.bf16.vlgmr.msrb.gmra.mxu0 %vm215_vm2, %v552_v19  ;;  %799 = vmatmul.msk.bf16.vlgmr.msrb.gmra.mxu1 %vm215_vm2, %v552_v19  ;;  %v822_v19 = vld [vmem:[%s1211_s5] ss:$0 sm:$0xff] }
 0xbc0   :  { %v565_v21 = vpop.f32.mrf.mxu0  ;;  %v578_v23 = vpop.f32.mrf.mxu1 }
 0xbc1   :  { %v585_v22 = vrot.slane %v578_v23, 4  ;;  %v584_v28 = vrot.slane %v565_v21, 4 }
 0xbc3   :  { %v589_v24 = vadd.f32 %v585_v22, %v1166_v30  ;;  %v588_v29 = vadd.f32 %v584_v28, %v1173_v43 }
 0xbc5   :  { %871 = vtanh.f32 %v589_v24  ;;  %v590_v31 = vmul.f32 0.5, %v588_v29  ;;  %v591_v49 = vmul.f32 0.5, %v589_v24 }
 0xbc7   :  { %873 = vtanh.f32 %v590_v31 }
 0xbc8   :  { %v567_v25 = vpop.f32.mrf.mxu0  ;;  %v580_v26 = vpop.f32.mrf.mxu1 }
 0xbcb   :  { %v872_v27 = vpop.eup %871 }
 0xbcc   :  { %604 = vrot.lane.b32.xlu0 %v872_v27, %s969_s0 }
 0xbcd   :  { %v874_v33 = vpop.eup %873 }
 0xbce   :  { %v594_v37 = vmul.f32 0.5, %v874_v33 }
 0xbd0   :  { %v596_v38 = vadd.f32 0.5, %v594_v37 }
 0xbd2   :  { %v602_v47 = vmul.f32 %v600_v44, %v596_v38 }
 0xc3e   :  { %v605_v41 = vpop.permute.xlu0 %604 }
 0xc3f   :  { %v607_v42 = vmul.f32 %v605_v41, %v596_v38 }
 0xc41   :  { %609 = vrot.lane.b32.xlu1 %v607_v42, %s969_s0 }
 0xcb3   :  { %v610_v16 = vpop.permute.xlu1 %609 }
 0xcb4   :  { %v612_v34 = vadd.f32 %v610_v16, %v602_v47 }
 0xcb6   :  { %875 = vtanh.f32 %v612_v34 }
 0xcb7   :  { %877 = vtanh.f32 %v591_v49 }
 0xcbc   :  { %v876_v48 = vpop.eup %875 }
 0xcbd   :  { %615 = vrot.lane.b32.xlu2 %v876_v48, %s969_s0  ;;  %v878_v50 = vpop.eup %877 }
 0xcbe   :  { %v595_v51 = vmul.f32 0.5, %v878_v50 }
 0xcc0   :  { %v597_v52 = vadd.f32 0.5, %v595_v51 }
 0xd17   :  { %v616_v53 = vpop.permute.xlu2 %615 }
 0xd18   :  { %v618_v55 = vmul.f32 %v616_v53, %v597_v52 }
 0xd1a   :  { %v619_v15 = vpack.c.bf16 %v618_v55, %v618_v55 }
 0xd1c   :  { %v621_v20 = vrot.slane %v619_v15, 2 }
 0xd1e   :  { %800 = vmatmul.msk.bf16.vlgmr.msrb.gmra.mxu2 %vm215_vm2, %v621_v20  ;;  %801 = vmatmul.msk.bf16.vlgmr.msrb.gmra.mxu3 %vm215_vm2, %v621_v20 }
 0xda1   :  { %v634_v35 = vpop.f32.mrf.mxu2  ;;  %v647_v57 = vpop.f32.mrf.mxu3 }
 0xda2   :  { %v654_v58 = vrot.slane %v647_v57, 2  ;;  %v653_v63 = vrot.slane %v634_v35, 2 }
 0xda4   :  { %v658_v59 = vadd.f32 %v654_v58, %v1166_v30  ;;  %v657_v0 = vadd.f32 %v653_v63, %v1173_v43  ;;  %v76_v30 = vld [vmem:[#allocation5 + $0x30] sm:$0xff]  ;;  %v669_v43 = vrot.slane %v612_v34, 6 }
 0xda5   :  { %704 = vmatpush.msra.mxu0 %v76_v30 }
 0xda6   :  { %879 = vtanh.f32 %v658_v59  ;;  %v659_v1 = vmul.f32 0.5, %v657_v0  ;;  %v660_v56 = vmul.f32 0.5, %v658_v59 }
 0xda7   :  { %705 = vmatpush.msra.mxu0 %v75_v8 }
 0xda8   :  { %881 = vtanh.f32 %v659_v1 }
 0xda9   :  { %v636_v60 = vpop.f32.mrf.mxu2  ;;  %v649_v61 = vpop.f32.mrf.mxu3  ;;  %706 = vmatpush.msra.mxu0 %v74_v9 }
 0xdab   :  { %707 = vmatpush.msra.mxu0 %v73_v10 }
 0xdac   :  { %v880_v62 = vpop.eup %879 }
 0xdad   :  { %673 = vrot.lane.b32.xlu0 %v880_v62, %s969_s0  ;;  %708 = vmatpush.msra.mxu0 %v72_v36 }
 0xdae   :  { %v882_v2 = vpop.eup %881 }
 0xdaf   :  { %v663_v3 = vmul.f32 0.5, %v882_v2  ;;  %709 = vmatpush.msra.mxu0 %v71_v46 }
 0xdb1   :  { %v665_v4 = vadd.f32 0.5, %v663_v3  ;;  %710 = vmatpush.msra.mxu0 %v70_v45 }
 0xdb3   :  { %v671_v32 = vmul.f32 %v669_v43, %v665_v4 }
 0xe1f   :  { %v674_v5 = vpop.permute.xlu0 %673 }
 0xe20   :  { %v676_v6 = vmul.f32 %v674_v5, %v665_v4 }
 0xe22   :  { %678 = vrot.lane.b32.xlu1 %v676_v6, %s969_s0 }
 0xe94   :  { %v679_v11 = vpop.permute.xlu1 %678 }
 0xe95   :  { %v681_v39 = vadd.f32 %v679_v11, %v671_v32 }
 0xe97   :  { %883 = vtanh.f32 %v681_v39 }
 0xe98   :  { %885 = vtanh.f32 %v660_v56 }
 0xe9d   :  { %v884_v40 = vpop.eup %883 }
 0xe9e   :  { %684 = vrot.lane.b32.xlu2 %v884_v40, %s969_s0  ;;  %v886_v12 = vpop.eup %885 }
 0xe9f   :  { %v664_v54 = vmul.f32 0.5, %v886_v12 }
 0xea1   :  { %v666_v13 = vadd.f32 0.5, %v664_v54 }
 0xef8   :  { %v685_v14 = vpop.permute.xlu2 %684 }
 0xef9   :  { %v687_v18 = vmul.f32 %v685_v14, %v666_v13 }
 0xefb   :  { %v692_v17 = vrot.slane %v687_v18, 6 }
 0xefd   :  { %802 = vmatmul.msk.f32.vlgmr.msra.gmra.mxu0 %vm215_vm2, %v692_v17 }
 0xf7a   :  { %v712_v21 = vpop.f32.mrf.mxu0 }
 0xf7b   :  { %v713_v23 = vadd.f32 %v822_v19, %v712_v21 }
 0xf7d   :  { %715 = vst [vmem:[#allocation7] sm:$0x3] %v713_v23 }
 0xf7e   :  { %726 = dma.vmem_to_hbm [thread:$0]  %s722_s28, 32, %s724_s7, [#allocation4]  }
 0xf7f   :  { %963 = dma.done.wait [#allocation4], 32  }
 0xf80   :  { %964 = vsyncadd [#allocation4], 4294967264 }
 0xf81   :  { %731 = vsyncpa [#allocation3], 1 }
 0xf82   :  { %732 = vsyncpa [#allocation6], 1 }
 0xf83   :  { %733 = vsyncpa [#allocation4], 1 }

</bundles_post_ra>
